<compile_context>
chip_gen: v7x
topology: tpu7x:2x2x1
jax: 0.10.0
libtpu: 0.0.40
codegen_flags: <defaults>
</compile_context>

<pallas_src>
import math
from functools import partial

import jax
import jax.numpy as jnp
from jax.experimental import pallas as pl
from jax.experimental.pallas import tpu as pltpu


_MXU_MIN_ROWS = 128          # below this, unrolled VPU MACs beat an MXU push
_TOPK_UNROLL_MAX = 8         # above this, use lax.fori_loop for the selection
_SINGLE_BLOCK_MAX_N = 65536  # full-block footprint stays under v5e's 16 MiB default
_SCORE_VMEM_LIMIT = 48 * 1024 * 1024  # headroom for the big tiles; < v7x 64 MiB


def _round_up(x, m):
    return ((x + m - 1) // m) * m


# ----------------------------------------------------------------------------
# Pallas kernels
# ----------------------------------------------------------------------------
def _score_kernel(xt_ref, w_ref, out_ref):
    """pool1 raw scores, lane-major.

    xt:[C, tile] (features on sublanes, nodes on lanes), w:[C, 1] pre-scaled by
    1/||w||, out:[1, tile] = sum_c w[c] * x[c, :]  (tanh deferred past top-k).
    """
    out_ref[...] = jnp.sum(xt_ref[...] * w_ref[...], axis=0, keepdims=True)


def _select_topk_rows(h, scores, dst_ref, k):
    """Pick the top-k rows of h (descending by `scores`), gate each row by
    tanh(score), and write them in order into dst_ref[0:k].

    h:[R, H] value, scores:[R, 1] raw (pre-tanh, already /||w||), k static.
    Ties resolve to the lowest row index (may differ from torch.topk on ties);
    NaN scores are not handled.
    """
    n_rows = h.shape[0]
    rid = jax.lax.broadcasted_iota(jnp.int32, (n_rows, 1), 0).astype(jnp.float32)
    neg = jnp.float32(-1e30)

    def pick(remaining):
        m = jnp.max(remaining, axis=0, keepdims=True)                    # [1,1]
        is_max = remaining >= m
        idx = jnp.min(jnp.where(is_max, rid, jnp.float32(n_rows)),
                      axis=0, keepdims=True)                             # first max
        onehot = (rid == idx).astype(jnp.float32)                        # [R,1]
        row = jnp.sum(h * onehot, axis=0, keepdims=True)                 # [1,H]
        return row * jnp.tanh(m), jnp.where(onehot > 0.0, neg, remaining)

    if k <= _TOPK_UNROLL_MAX:
        # Tiny k (k2=2, k3=1 at default ratios): fully unrolled is cheapest.
        remaining = scores
        for j in range(k):
            row, remaining = pick(remaining)
            dst_ref[j:j + 1, :] = row
    else:
        # Larger k: bound vreg live ranges / instruction memory with fori_loop.
        def body(j, remaining):
            row, rem = pick(remaining)
            dst_ref[pl.ds(j, 1), :] = row
            return rem
        jax.lax.fori_loop(0, k, body, scores)


def _fused_tail_kernel(x_ref, s1_ref, slab_ref, out_ref, h2_ref, h3_ref):
    """Fused: pool1 gate -> nn1 -> pool2 (score/top-k/gate) ->
              pool3 (score/top-k/gate) -> nn2.

    x:[k1,Cin] selected raw nodes, s1:[k1,1] raw pool1 scores (pre-tanh).
    slab:[Cin+Cout+4, H] packed params:
        row 0              : nn1 bias
        rows 1 .. Cin      : nn1 W^T   (row 1+c = column c of PyTorch W)
        row 1+Cin          : pool2 w / ||w||
        row 2+Cin          : pool3 w / ||w||
        rows 3+Cin .. +Cout: nn2 W     (PyTorch [out, in] rows)
        row 3+Cin+Cout     : nn2 bias padded to H (first Cout lanes valid)
    out:[k3,Cout].  h2_ref:[k2,H], h3_ref:[k3,H] VMEM scratch.
    """
    k1, c_in = x_ref.shape
    k3, c_out = out_ref.shape

    row_b1 = 0
    row_w1 = 1
    row_p2 = 1 + c_in
    row_p3 = 2 + c_in
    row_w2 = 3 + c_in
    row_b2 = 3 + c_in + c_out

    # ---- nn1:  nn1(x * gate) = gate * (x @ W1^T) + b1  (gate per-row scalar) --
    gate1 = jnp.tanh(s1_ref[...])                                        # [k1,1]
    if k1 >= _MXU_MIN_ROWS:
        # Big-k1 path: one MXU matmul instead of unrolled VPU MACs.
        h1 = gate1 * jnp.dot(x_ref[...], slab_ref[row_w1:row_w1 + c_in, :],
                             preferred_element_type=jnp.float32) \
             + slab_ref[row_b1:row_b1 + 1, :]
    else:
        acc = x_ref[:, 0:1] * slab_ref[row_w1:row_w1 + 1, :]             # [k1,H]
        for c in range(1, c_in):
            acc = acc + x_ref[:, c:c + 1] * slab_ref[row_w1 + c:row_w1 + c + 1, :]
        h1 = gate1 * acc + slab_ref[row_b1:row_b1 + 1, :]                # [k1,H]

    # ---- pool2: score + in-kernel top-k2 + gate ------------------------------
    s2 = jnp.sum(h1 * slab_ref[row_p2:row_p2 + 1, :], axis=1, keepdims=True)
    _select_topk_rows(h1, s2, h2_ref, h2_ref.shape[0])
    h2 = h2_ref[...]                                                     # [k2,H]

    # ---- pool3: score + in-kernel top-k3 + gate ------------------------------
    s3 = jnp.sum(h2 * slab_ref[row_p3:row_p3 + 1, :], axis=1, keepdims=True)
    _select_topk_rows(h2, s3, h3_ref, h3_ref.shape[0])
    h3 = h3_ref[...]                                                     # [k3,H]

    # ---- nn2: accumulate all Cout columns, one dense store -------------------
    b2 = slab_ref[row_b2:row_b2 + 1, 0:c_out]                            # [1,Cout]
    if k3 >= _MXU_MIN_ROWS:
        out_ref[...] = jax.lax.dot_general(
            h3, slab_ref[row_w2:row_w2 + c_out, :],
            (((1,), (1,)), ((), ())),
            preferred_element_type=jnp.float32) + b2
    else:
        lane = jax.lax.broadcasted_iota(jnp.int32, (1, c_out), 1)
        res = jnp.zeros((k3, c_out), jnp.float32)
        for j in range(c_out):
            col = jnp.sum(h3 * slab_ref[row_w2 + j:row_w2 + j + 1, :],
                          axis=1, keepdims=True)                         # [k3,1]
            res = res + jnp.where(lane == j, col, 0.0)
        out_ref[...] = res + b2                                          # one store


# ----------------------------------------------------------------------------
# pallas_call wrappers
# ----------------------------------------------------------------------------
def _full_spec(shape):
    return pl.BlockSpec(shape, lambda i: tuple(0 for _ in shape))


def topk_scores(x_t, w_col, *, tile_n=131072):
    """Raw pool1 scores: x_t:[C,N] lane-major, w_col:[C,1] -> [1,N]."""
    c, n = x_t.shape
    if n <= min(tile_n, _SINGLE_BLOCK_MAX_N):
        # Small-N: one full-array block, one grid step.
        return pl.pallas_call(
            _score_kernel,
            out_shape=jax.ShapeDtypeStruct((1, n), jnp.float32),
            grid=(1,),
            in_specs=[_full_spec((c, n)), _full_spec((c, 1))],
            out_specs=_full_spec((1, n)),
        )(x_t, w_col)

    # Large-N: cdiv-tiled node axis (edge block padded/masked by Pallas).  The
    # tile is capped so the grid always has >= 2 points, keeping both v7x
    # TensorCores busy via the "parallel" axis, while the double-buffered
    # footprint stays well under every generation's VMEM.
    tile = min(tile_n, _round_up(pl.cdiv(n, 2), 128))
    return pl.pallas_call(
        _score_kernel,
        out_shape=jax.ShapeDtypeStruct((1, n), jnp.float32),
        grid=(pl.cdiv(n, tile),),
        in_specs=[pl.BlockSpec((c, tile), lambda i: (0, i)),
                  pl.BlockSpec((c, 1), lambda i: (0, 0))],
        out_specs=pl.BlockSpec((1, tile), lambda i: (0, i)),
        compiler_params=pltpu.CompilerParams(
            dimension_semantics=("parallel",),
            vmem_limit_bytes=_SCORE_VMEM_LIMIT),
    )(x_t, w_col)


def fused_tail(x1, s1_col, slab, *, k2, k3, c_out):
    k1, c_in = x1.shape
    hidden = slab.shape[1]
    return pl.pallas_call(
        _fused_tail_kernel,
        out_shape=jax.ShapeDtypeStruct((k3, c_out), jnp.float32),
        grid=(1,),
        in_specs=[
            _full_spec((k1, c_in)),     # x1 (selected raw nodes)
            _full_spec((k1, 1)),        # raw pool1 scores (selected)
            _full_spec(slab.shape),     # packed parameter slab
        ],
        out_specs=_full_spec((k3, c_out)),
        scratch_shapes=[pltpu.VMEM((k2, hidden), jnp.float32),
                        pltpu.VMEM((k3, hidden), jnp.float32)],
    )(x1, s1_col, slab)


# ----------------------------------------------------------------------------
# Params (PyTorch-convention) + one-time kernel-layout prep (outside jit)
# ----------------------------------------------------------------------------
def _ceil_k(ratio, n):
    return max(1, int(math.ceil(ratio * n)))


def init_params():
    key = jax.random.PRNGKey(42)
    ks = jax.random.split(key, 7)
    return {
        # TopKPooling weights: shape (1, in_channels), PyG convention
        "pool1_w": jax.random.normal(ks[0], (1, 5), jnp.float32) * 0.5,
        "pool2_w": jax.random.normal(ks[1], (1, 64), jnp.float32) * 0.1,
        "pool3_w": jax.random.normal(ks[2], (1, 64), jnp.float32) * 0.1,
        # Linear layers, PyTorch convention [out, in] + [out]
        "nn1_w": jax.random.normal(ks[3], (64, 5), jnp.float32) / math.sqrt(5.0),
        "nn1_b": jax.random.normal(ks[4], (64,), jnp.float32) * 0.01,
        "nn2_w": jax.random.normal(ks[5], (3, 64), jnp.float32) / math.sqrt(64.0),
        "nn2_b": jax.random.normal(ks[6], (3,), jnp.float32) * 0.01,
    }


def prepare_params(params):
    """Fold all constant prep (transposes, 1/||w|| scaling, slab packing) out
    of the traced forward so the jit graph contains only the two kernels plus
    the single top_k/gather."""
    def unit(w):
        return w / jnp.sqrt(jnp.sum(w * w))

    hidden, c_in = params["nn1_w"].shape          # 64, 5
    c_out = params["nn2_w"].shape[0]              # 3
    b2_row = jnp.zeros((1, hidden), jnp.float32).at[0, :c_out].set(params["nn2_b"])
    slab = jnp.concatenate([
        params["nn1_b"][None, :],                 # row 0           : nn1 bias
        jnp.transpose(params["nn1_w"]),           # rows 1..c_in    : nn1 W^T
        unit(params["pool2_w"]),                  # row 1+c_in      : pool2 w/||w||
        unit(params["pool3_w"]),                  # row 2+c_in      : pool3 w/||w||
        params["nn2_w"],                          # rows 3+c_in..   : nn2 W
        b2_row,                                   # last row        : nn2 bias (padded)
    ], axis=0).astype(jnp.float32)                # [c_in+c_out+4, hidden]
    return {
        "pool1_w_col": jnp.transpose(unit(params["pool1_w"])),   # [5, 1]
        "slab": slab,
        "c_out": c_out,
    }


# ----------------------------------------------------------------------------
# Net forward
# ----------------------------------------------------------------------------
def net_forward(x_t, edge_index, batch, prep):
    """x_t: node features stored feature-major [C, N] (column j = node j)."""
    del edge_index, batch  # TODO(synk): filter_adj / per-graph batching not implemented
    x_t = x_t.astype(jnp.float32)
    c, n = x_t.shape
    k1 = _ceil_k(0.01, n)
    k2 = _ceil_k(0.1, k1)
    k3 = _ceil_k(0.1, k2)

    # Kernel 1: raw pool1 scores, lane-major [C,N] -> [1,N] (tanh deferred).
    s1 = topk_scores(x_t, prep["pool1_w_col"])                  # [1, N]

    # Glue: the single full-N selection + a tiny k1-column gather.  Kept in XLA:
    # a per-row pl.Element gather would cost k1 grid steps of fixed overhead,
    # more than this one small gather at k1 ~ 16.
    v1, i1 = jax.lax.top_k(s1[0, :], k1)                        # raw scores, desc
    x1 = jnp.take(x_t, i1, axis=1).T                            # [k1, C]

    # Kernel 2: pool1 gate + nn1 + pool2 + pool3 + nn2, all fused.
    return fused_tail(x1, v1[:, None], prep["slab"],
                      k2=k2, k3=k3, c_out=prep["c_out"])        # [k3, 3]


# ----------------------------------------------------------------------------
# Main
# ----------------------------------------------------------------------------
if __name__ == "__main__":
    N, C = 1600, 5  # ratio=0.01 => k1=16, then k2=2, k3=1
    key = jax.random.PRNGKey(0)
    kx, ke = jax.random.split(key)
    x = jax.random.normal(kx, (N, C), jnp.float32)              # node-major, per spec
    edge_index = jax.random.randint(ke, (2, 4 * N), 0, N, dtype=jnp.int32)
    batch = jnp.zeros((N,), jnp.int32)  # single graph

    # One-time data-layout prep (outside the jitted forward): store node
    # features feature-major [C, N] so no full-array transpose runs per call.
    x_t = jax.block_until_ready(jnp.transpose(x))

    params = init_params()
    prep = prepare_params(params)       # one-time layout/scaling/slab prep

    # Sanity: the cdiv-tiled (padded-edge, "parallel") score path matches the
    # single-block path on the same data.
    s_full = topk_scores(x_t, prep["pool1_w_col"])
    s_tiled = topk_scores(x_t, prep["pool1_w_col"], tile_n=512)
    assert bool(jnp.allclose(s_full, s_tiled))

    fwd = jax.jit(partial(net_forward, prep=prep))
    out = jax.block_until_ready(fwd(x_t, edge_index, batch))

    assert out.shape == (1, 3) and out.dtype == jnp.float32
    assert bool(jnp.all(jnp.isfinite(out)))
    print("KERNEL_OK")
</pallas_src>

<mosaic_0001>
module attributes {stable_mosaic.version = 11 : i64} {
  func.func @_score_kernel(%arg0: i32, %arg1: memref<5x1600xf32, #tpu.memory_space<vmem>>, %arg2: memref<5x1xf32, #tpu.memory_space<vmem>>, %arg3: memref<1x1600xf32, #tpu.memory_space<vmem>>) attributes {dimension_semantics = [#tpu.dimension_semantics<arbitrary>], iteration_bounds = array<i64: 1>, scalar_prefetch = 0 : i64, scratch_operands = 0 : i64, tpu.core_type = #tpu.core_type<tc>, window_params = [{pipeline_mode = #tpu.pipeline_mode<synchronous>, transform_indices = @transform_0, window_bounds = array<i64: 5, 1600>}, {pipeline_mode = #tpu.pipeline_mode<synchronous>, transform_indices = @transform_1, window_bounds = array<i64: 5, 1>}, {pipeline_mode = #tpu.pipeline_mode<synchronous>, transform_indices = @transform_2, window_bounds = array<i64: 1, 1600>}]} {
    %c0 = arith.constant 0 : index
    %c0_0 = arith.constant 0 : index
    %0 = vector.load %arg1[%c0, %c0_0] : memref<5x1600xf32, #tpu.memory_space<vmem>>, vector<5x1600xf32>
    %c0_1 = arith.constant 0 : index
    %c0_2 = arith.constant 0 : index
    %1 = vector.load %arg2[%c0_1, %c0_2] : memref<5x1xf32, #tpu.memory_space<vmem>>, vector<5x1xf32>
    %2 = vector.broadcast %1 : vector<5x1xf32> to vector<5x1600xf32>
    %3 = arith.mulf %0, %2 : vector<5x1600xf32>
    %cst = arith.constant dense<0.000000e+00> : vector<1600xf32>
    %4 = vector.multi_reduction <add>, %3, %cst [0] : vector<5x1600xf32> to vector<1600xf32>
    %5 = vector.shape_cast %4 : vector<1600xf32> to vector<1x1600xf32>
    %c0_3 = arith.constant 0 : index
    %c0_4 = arith.constant 0 : index
    %6 = vector.load %arg3[%c0_3, %c0_4] : memref<1x1600xf32, #tpu.memory_space<vmem>>, vector<1x1600xf32>
    tpu.vector_store %arg3[%c0_3, %c0_4], %5 {strides = array<i32>} : memref<1x1600xf32, #tpu.memory_space<vmem>>, vector<1x1600xf32>,
    return
  }
  func.func @transform_0(%arg0: i32) -> (i32, i32) {
    %c0_i32 = arith.constant 0 : i32
    %c0_i32_0 = arith.constant 0 : i32
    %c0_i32_1 = arith.constant 0 : i32
    return %c0_i32, %c0_i32_0 : i32, i32
  }
  func.func @transform_1(%arg0: i32) -> (i32, i32) {
    %c0_i32 = arith.constant 0 : i32
    %c0_i32_0 = arith.constant 0 : i32
    %c0_i32_1 = arith.constant 0 : i32
    return %c0_i32, %c0_i32_0 : i32, i32
  }
  func.func @transform_2(%arg0: i32) -> (i32, i32) {
    %c0_i32 = arith.constant 0 : i32
    %c0_i32_0 = arith.constant 0 : i32
    %c0_i32_1 = arith.constant 0 : i32
    return %c0_i32, %c0_i32_0 : i32, i32
  }
}

</mosaic_0001>

<bundles_post_ra>
// kernel: tpu_custom_call.1
= control target key start
LH: loop header
LB: loop body
LE: loop exit
PB: predicated region body
PF: predicated region fallthrough
CT: control target
= control target key end

     0   :  { %7 = vsyncpa [#allocation3], 0  ;;  %s406_s0 = inlined_call_operand.hbm [shape: f32[5,1600], index: 0, kind: input, shape index: {}]   ;;  %s407_s1 = inlined_call_operand.vmem [shape: f32[5,1], index: 1, kind: input, shape index: {}]   ;;  %s408_s2 = inlined_call_operand.hbm [shape: f32[1,1600], index: 2, kind: output, shape index: {}]  }
   0x1   :  { %8 = vsyncpa [#allocation4], 0  ;;  %s326_s9 = smov [#allocation2]   ;;  %s278_s13 = scalar_lea.hbm %s406_s0, 1664 }
   0x2   :  { %s15_s10 = sshll.u32 %s326_s9, 4  ;;  %p279_p0 = scmp.ne.s32.totalorder %s406_s0, %s278_s13  ;;  %s16_s10 = int_to_ptr.vmem [resolvable:$true] %s15_s10 }
   0x3   :  { %p282_p1 = scmp.lt.u32.totalorder %s278_s13, %s406_s0 }
   0x5   :  { %p284_p2 = pnand %p282_p1, %p279_p0 }
   0x7   :  { %287 = shalt.err (!%p284_p2)
}
   0x8   :  { %s288_s18 = scalar_lea.vmem %s16_s10, 1664  ;;  %p293_p4 = scmp.lt.s32.totalorder %s16_s10, %s16_s10 }
   0x9   :  { %p289_p3 = scmp.ne.s32.totalorder %s16_s10, %s288_s18  ;;  %p294_p5 = scmp.lt.s32.totalorder %s288_s18, %s288_s18 }
   0xb   :  { %p295_p6 = por %p294_p5, %p293_p4 }
   0xd   :  { %p296_p7 = pnand %p295_p6, %p289_p3 }
   0xf   :  { %299 = shalt.err (!%p296_p7)
}
  0x10   :  { %18 = dma.hbm_to_vmem [thread:$0]  %s406_s0, 1664, %s16_s10, [#allocation3]  }
  0x11   :  { %322 = dma.done.wait [#allocation3], 1664  }
  0x12   :  { %323 = vsyncadd [#allocation3], 4294965632  ;;  %v327_v0 = vmov 0   ;;  %v37_v1 = vld [vmem:[%s407_s1] sm:$0x1f]  ;;  %v169_v4 = vlaneseq  ;;  %vm56_vm0 = vcmask 1044480  }
  0x13   :  { %277 = vset.pattern.permute.xlu0 %v327_v0  ;;  %v328_v2 = vmov 1966171168   ;;  %v24_v5 = vld [vmem:[#allocation2] sm:$0x1f]  ;;  %v25_v8 = vld [vmem:[#allocation2 + $0x8] sm:$0x1f] }
  0x14   :  { %40 = vperm.xlu0 %277, %v37_v1   ;;  %v167_v3 = vunpack.c.l.s4 %v328_v2  ;;  %v170_v7 = vshrl.u32 %v169_v4, 7  ;;  %v26_v9 = vld [vmem:[#allocation2 + $0x10] sm:$0x1f]  ;;  %v27_v10 = vld [vmem:[#allocation2 + $0x18] sm:$0x1f]  ;;  %vm141_vm1 = vcmask 520192  }
  0x15   :  { %v28_v11 = vld [vmem:[#allocation2 + $0x20] sm:$0x1f]  ;;  %v29_v12 = vld [vmem:[#allocation2 + $0x28] sm:$0x1f]  ;;  %v30_v13 = vld [vmem:[#allocation2 + $0x30] sm:$0x1f] }
  0x16   :  { %v168_v6 = vunpack.c.0.s8 %v167_v3  ;;  %v31_v14 = vld [vmem:[#allocation2 + $0x38] sm:$0x1f]  ;;  %v32_v15 = vld [vmem:[#allocation2 + $0x40] sm:$0x1f]  ;;  %v33_v16 = vld [vmem:[#allocation2 + $0x48] sm:$0x1f] }
  0x17   :  { %v34_v18 = vld [vmem:[#allocation2 + $0x50] sm:$0x1f]  ;;  %v35_v19 = vld [vmem:[#allocation2 + $0x58] sm:$0x1f]  ;;  %v36_v21 = vld [vmem:[#allocation2 + $0x60] sm:$0x1f] }
  0x18   :  { %v361_v20 = vsub.s32 %v168_v6, %v170_v7  ;;  %s329_s0 = smov [#allocation5]   ;;  %vm255_vm2 = vcmp.lt.s32.totalorder %v169_v4, 576 }
  0x19   :  { %s264_s1 = sshll.u32 %s329_s0, 4  ;;  %s265_s1 = int_to_ptr.vmem [resolvable:$true] %s264_s1 }
  0x1a   :  { %s300_s23 = scalar_lea.vmem %s265_s1, 208  ;;  %s304_s24 = scalar_lea.vmem %s265_s1, 224 }
  0x1b   :  { %p301_p8 = scmp.ne.s32.totalorder %s265_s1, %s300_s23  ;;  %p305_p9 = scmp.lt.s32.totalorder %s265_s1, %s265_s1 }
  0x1c   :  { %p306_p10 = scmp.lt.s32.totalorder %s304_s24, %s300_s23 }
  0x1e   :  { %p307_p11 = por %p306_p10, %p305_p9 }
  0x20   :  { %p308_p12 = pnand %p307_p11, %p301_p8 }
  0x93   :  { %v41_v17 = vpop.permute.xlu0 %40 }
  0x94   :  { %v43_v22 = vmul.f32 %v41_v17, %v24_v5  ;;  %v44_v23 = vmul.f32 %v41_v17, %v25_v8  ;;  %v45_v24 = vmul.f32 %v41_v17, %v26_v9  ;;  %v46_v25 = vmul.f32 %v41_v17, %v27_v10 }
  0x95   :  { %v47_v26 = vmul.f32 %v41_v17, %v28_v11  ;;  %v48_v27 = vmul.f32 %v41_v17, %v29_v12  ;;  %v49_v28 = vmul.f32 %v41_v17, %v30_v13  ;;  %v50_v29 = vmul.f32 %v41_v17, %v31_v14 }
  0x96   :  { %v51_v30 = vmul.f32 %v41_v17, %v32_v15  ;;  %v52_v31 = vmul.f32 %v41_v17, %v33_v16  ;;  %v53_v32 = vmul.f32 %v41_v17, %v34_v18  ;;  %v363_v33 = vmul.f32 %v41_v17, %v35_v19 }
  0x97   :  { %v365_v34 = vmul.f32 %v41_v17, %v36_v21  ;;  %v57_v35 = vsel %vm56_vm0, %v43_v22, 0.0  ;;  %v64_v36 = vsel %vm56_vm0, %v44_v23, 0.0  ;;  %v71_v37 = vsel %vm56_vm0, %v45_v24, 0.0 }
  0x98   :  { %v58_v38 = vrot.slane %v57_v35, 4  ;;  %v65_v39 = vrot.slane %v64_v36, 4  ;;  %v72_v40 = vrot.slane %v71_v37, 4  ;;  %v78_v41 = vsel %vm56_vm0, %v46_v25, 0.0 }
  0x99   :  { %v79_v42 = vrot.slane %v78_v41, 4  ;;  %v85_v43 = vsel %vm56_vm0, %v47_v26, 0.0  ;;  %v92_v44 = vsel %vm56_vm0, %v48_v27, 0.0  ;;  %v99_v45 = vsel %vm56_vm0, %v49_v28, 0.0 }
  0x9a   :  { %v59_v46 = vadd.f32 %v58_v38, %v57_v35  ;;  %v66_v47 = vadd.f32 %v65_v39, %v64_v36  ;;  %v73_v48 = vadd.f32 %v72_v40, %v71_v37  ;;  %v86_v49 = vrot.slane %v85_v43, 4 }
  0x9b   :  { %v80_v50 = vadd.f32 %v79_v42, %v78_v41  ;;  %v93_v51 = vrot.slane %v92_v44, 4  ;;  %v100_v52 = vrot.slane %v99_v45, 4  ;;  %v106_v53 = vsel %vm56_vm0, %v50_v29, 0.0 }
  0x9c   :  { %v60_v54 = vrot.slane %v59_v46, 2  ;;  %v67_v55 = vrot.slane %v66_v47, 2  ;;  %v74_v56 = vrot.slane %v73_v48, 2  ;;  %v87_v57 = vadd.f32 %v86_v49, %v85_v43 }
  0x9d   :  { %v81_v58 = vrot.slane %v80_v50, 2  ;;  %v94_v59 = vadd.f32 %v93_v51, %v92_v44  ;;  %v101_v60 = vadd.f32 %v100_v52, %v99_v45  ;;  %v107_v61 = vrot.slane %v106_v53, 4 }
  0x9e   :  { %v61_v62 = vadd.f32 %v60_v54, %v59_v46  ;;  %v68_v63 = vadd.f32 %v67_v55, %v66_v47  ;;  %v75_v0 = vadd.f32 %v74_v56, %v73_v48  ;;  %v88_v1 = vrot.slane %v87_v57, 2 }
  0x9f   :  { %v82_v2 = vadd.f32 %v81_v58, %v80_v50  ;;  %v95_v3 = vrot.slane %v94_v59, 2  ;;  %v102_v5 = vrot.slane %v101_v60, 2  ;;  %v108_v6 = vadd.f32 %v107_v61, %v106_v53 }
  0xa0   :  { %v62_v7 = vrot.slane %v61_v62, 1  ;;  %v69_v8 = vrot.slane %v68_v63, 1  ;;  %v76_v9 = vrot.slane %v75_v0, 1  ;;  %v89_v10 = vadd.f32 %v88_v1, %v87_v57 }
  0xa1   :  { %v83_v11 = vrot.slane %v82_v2, 1  ;;  %v96_v12 = vadd.f32 %v95_v3, %v94_v59  ;;  %v103_v13 = vadd.f32 %v102_v5, %v101_v60  ;;  %v109_v14 = vrot.slane %v108_v6, 2 }
  0xa2   :  { %v63_v15 = vadd.f32 %v62_v7, %v61_v62  ;;  %v70_v16 = vadd.f32 %v69_v8, %v68_v63  ;;  %v77_v17 = vadd.f32 %v76_v9, %v75_v0  ;;  %v90_v18 = vrot.slane %v89_v10, 1 }
  0xa3   :  { %v84_v19 = vadd.f32 %v83_v11, %v82_v2  ;;  %v97_v21 = vrot.slane %v96_v12, 1  ;;  %v104_v22 = vrot.slane %v103_v13, 1  ;;  %v110_v23 = vadd.f32 %v109_v14, %v108_v6 }
  0xa4   :  { %v91_v24 = vadd.f32 %v90_v18, %v89_v10  ;;  %v113_v25 = vsel %vm56_vm0, %v51_v30, 0.0  ;;  %v120_v26 = vsel %vm56_vm0, %v52_v31, 0.0  ;;  %v127_v27 = vsel %vm56_vm0, %v53_v32, 0.0 }
  0xa5   :  { %v98_v28 = vadd.f32 %v97_v21, %v96_v12  ;;  %v105_v29 = vadd.f32 %v104_v22, %v103_v13  ;;  %v111_v35 = vrot.slane %v110_v23, 1  ;;  %v114_v36 = vrot.slane %v113_v25, 4 }
  0xa6   :  { %v121_v37 = vrot.slane %v120_v26, 4  ;;  %v128_v38 = vrot.slane %v127_v27, 4  ;;  %v134_v39 = vsel %vm56_vm0, %v363_v33, 0.0  ;;  %v142_v40 = vsel %vm141_vm1, %v365_v34, 0.0 }
  0xa7   :  { %v112_v41 = vadd.f32 %v111_v35, %v110_v23  ;;  %v115_v42 = vadd.f32 %v114_v36, %v113_v25  ;;  %v135_v43 = vrot.slane %v134_v39, 4  ;;  %v143_v30 = vrot.slane %v142_v40, 4 }
  0xa8   :  { %v122_v44 = vadd.f32 %v121_v37, %v120_v26  ;;  %v129_v31 = vadd.f32 %v128_v38, %v127_v27  ;;  %v162_v45 = vcombine.low %v63_v15, %v70_v16  ;;  %v163_v32 = vcombine.low %v77_v17, %v84_v19 }
  0xa9   :  { %v116_v46 = vrot.slane %v115_v42, 2  ;;  %v136_v47 = vadd.f32 %v135_v43, %v134_v39  ;;  %v144_v48 = vadd.f32 %v143_v30, %v142_v40  ;;  %v164_v49 = vcombine.low %v91_v24, %v98_v28 }
  0xaa   :  { %v123_v50 = vrot.slane %v122_v44, 2  ;;  %v130_v51 = vrot.slane %v129_v31, 2  ;;  %v165_v52 = vcombine.low %v105_v29, %v112_v41  ;;  %v172_v33 = vrot.slane %v162_v45, %v361_v20 }
  0xab   :  { %v117_v53 = vadd.f32 %v116_v46, %v115_v42  ;;  %v137_v54 = vrot.slane %v136_v47, 2  ;;  %v145_v34 = vrot.slane %v144_v48, 2  ;;  %v179_v55 = vrot.slane %v163_v32, %v361_v20 }
  0xac   :  { %v124_v56 = vadd.f32 %v123_v50, %v122_v44  ;;  %v131_v57 = vadd.f32 %v130_v51, %v129_v31  ;;  %v186_v58 = vrot.slane %v164_v49, %v361_v20  ;;  %v193_v59 = vrot.slane %v165_v52, %v361_v20 }
  0xad   :  { %v118_v60 = vrot.slane %v117_v53, 1  ;;  %v138_v61 = vadd.f32 %v137_v54, %v136_v47  ;;  %v146_v62 = vadd.f32 %v145_v34, %v144_v48  ;;  %v194_v63 = vcombine.low %v172_v33, %v179_v55 }
  0xae   :  { %v125_v0 = vrot.slane %v124_v56, 1  ;;  %v132_v1 = vrot.slane %v131_v57, 1  ;;  %v195_v2 = vcombine.low %v186_v58, %v193_v59 }
  0xaf   :  { %v119_v3 = vadd.f32 %v118_v60, %v117_v53  ;;  %v139_v5 = vrot.slane %v138_v61, 1  ;;  %v147_v6 = vrot.slane %v146_v62, 1  ;;  %v202_v7 = vrot.slane %v194_v63, %v361_v20 }
  0xb0   :  { %v126_v8 = vadd.f32 %v125_v0, %v124_v56  ;;  %v133_v9 = vadd.f32 %v132_v1, %v131_v57  ;;  %v209_v10 = vrot.slane %v195_v2, %v361_v20 }
  0xb1   :  { %v140_v11 = vadd.f32 %v139_v5, %v138_v61  ;;  %v148_v12 = vadd.f32 %v147_v6, %v146_v62 }
  0xb2   :  { %v210_v13 = vcombine.low %v202_v7, %v209_v10  ;;  %v211_v14 = vcombine.low %v119_v3, %v126_v8 }
  0xb3   :  { %v212_v15 = vcombine.low %v133_v9, %v140_v11  ;;  %v233_v18 = vrot.slane %v148_v12, %v361_v20 }
  0xb4   :  { %v219_v16 = vrot.slane %v211_v14, %v361_v20  ;;  %252 = vst [vmem:[#allocation5] sm:$0xff] %v210_v13 }
  0xb5   :  { %v226_v17 = vrot.slane %v212_v15, %v361_v20  ;;  %v248_v22 = vrot.slane %v233_v18, %v361_v20 }
  0xb7   :  { %v234_v19 = vcombine.low %v219_v16, %v226_v17 }
  0xb9   :  { %v241_v21 = vrot.slane %v234_v19, %v361_v20 }
  0xbb   :  { %v249_v23 = vcombine.low %v241_v21, %v248_v22 }
  0xbd   :  { %257 = vst.msk [vmem:[#allocation5 + $0x8] sm:$0x1f] %vm255_vm2, %v249_v23 }
  0xbe   :  { %311 = shalt.err (!%p308_p12)
}
  0xbf   :  { %s312_s27 = scalar_lea.hbm %s408_s2, 208 }
  0xc0   :  { %p313_p13 = scmp.ne.s32.totalorder %s408_s2, %s312_s27  ;;  %p316_p0 = scmp.lt.u32.totalorder %s312_s27, %s408_s2 }
  0xc2   :  { %p318_p1 = pnand %p316_p0, %p313_p13 }
  0xc4   :  { %321 = shalt.err (!%p318_p1)
}
  0xc5   :  { %267 = dma.vmem_to_hbm [thread:$0]  %s265_s1, 208, %s408_s2, [#allocation4]  }
  0xc6   :  { %324 = dma.done.wait [#allocation4], 208  }
  0xc7   :  { %325 = vsyncadd [#allocation4], 4294967088 }
  0xc8   :  { %271 = vsyncpa [#allocation3], 1 }
  0xc9   :  { %272 = vsyncpa [#allocation4], 1 }

</bundles_post_ra>
